<compile_context>
chip_gen: v7x
topology: tpu7x:2x2x1
jax: 0.10.0
libtpu: 0.0.40
codegen_flags: <defaults>
</compile_context>

<pallas_src>
import functools
import math

import jax
import jax.numpy as jnp
from jax.experimental import pallas as pl
from jax.experimental.pallas import tpu as pltpu


def _round_up(n, m):
    return ((n + m - 1) // m) * m


def _pick_tile(n, target, mults=(128, 8)):
    """Largest t <= target dividing n, preferring lane-aligned (128) tiles; fall back to n."""
    if n <= target:
        return n
    for m in mults:
        t = (target // m) * m
        while t >= m:
            if n % t == 0:
                return t
            t -= m
    return n


@functools.lru_cache(maxsize=1)
def _vmem_budget():
    """Generation-aware VMEM limit: leave headroom below physical per-core capacity."""
    try:
        cap = int(pltpu.get_tpu_info().vmem_capacity_bytes)
        return min(cap - 10 * 1024 * 1024, int(cap * 0.85))
    except Exception:
        return 64 * 1024 * 1024  # safe on every generation


# ----------------------------------------------------------------------------
# Kernel 0: K/V projection (per batch, tiled over key length).
#   kv = ctx @ [Wk | Wv]  (one full-width MXU matmul)
#   K stored pre-transposed per head: [B, n_heads, d_head, Mp]  (lane-dense stores,
#   no per-query-tile transpose later);  V stored head-major: [B, n_heads, Mp, d_head].
# ----------------------------------------------------------------------------
def _kv_proj_kernel(ctx_ref, wkv_ref, k_ref, v_ref, *, n_heads, d_head):
    d_inner = n_heads * d_head
    c = ctx_ref[0].astype(jnp.bfloat16)                                    # [TM, Dc]
    kv = jnp.dot(c, wkv_ref[...], preferred_element_type=jnp.float32)      # [TM, 2*d_inner]
    kT = kv[:, :d_inner].T                                                 # [d_inner, TM]
    for h in range(n_heads):                                               # static unroll
        k_ref[0, h] = kT[h * d_head:(h + 1) * d_head, :].astype(k_ref.dtype)
        v_ref[0, h] = kv[:, d_inner + h * d_head:
                         d_inner + (h + 1) * d_head].astype(v_ref.dtype)


def kv_project(ctx, wkv, *, n_heads, d_head, tm):
    B, Mp, Dc = ctx.shape
    two_inner = wkv.shape[1]
    kernel = functools.partial(_kv_proj_kernel, n_heads=n_heads, d_head=d_head)
    k_sd = jax.ShapeDtypeStruct((B, n_heads, d_head, Mp), jnp.bfloat16)
    v_sd = jax.ShapeDtypeStruct((B, n_heads, Mp, d_head), jnp.bfloat16)
    return pl.pallas_call(
        kernel,
        out_shape=(k_sd, v_sd),
        grid_spec=pltpu.PrefetchScalarGridSpec(
            num_scalar_prefetch=0, grid=(B, Mp // tm),
            in_specs=[
                pl.BlockSpec((1, tm, Dc), lambda b, m: (b, m, 0)),
                pl.BlockSpec((Dc, two_inner), lambda b, m: (0, 0)),
            ],
            out_specs=[
                pl.BlockSpec((1, n_heads, d_head, tm), lambda b, m: (b, 0, 0, m)),
                pl.BlockSpec((1, n_heads, tm, d_head), lambda b, m: (b, 0, m, 0)),
            ],
        ),
        compiler_params=pltpu.CompilerParams(
            dimension_semantics=("parallel", "parallel"),
            vmem_limit_bytes=_vmem_budget()),
    )(ctx, wkv)


# ----------------------------------------------------------------------------
# Kernel 1: fused  y = LayerNorm(x + Attention(x; K, V) @ Wo + bo)
#   grid = (B, N//TQ, n_heads), head axis is an "arbitrary" reduction axis:
#     h == 0        : q_all = x @ Wq_full  (full-width MXU), scattered to a per-head scratch
#     every h       : sim = q_h @ K_h^T (K pre-transposed), softmax, av_h = p @ V_h -> scratch
#     h == last     : attn = concat(av_h) @ Wo_full (full-width), residual + LayerNorm
# ----------------------------------------------------------------------------
def _attn_ln_kernel(x_ref, kT_ref, v_ref, wq_ref, wo_ref, bo_ref, g_ref, b_ref, o_ref,
                    q_scr, av_scr, *, n_heads, d_head, eps, m_true, m_pad):
    h = pl.program_id(2)

    @pl.when(h == 0)
    def _():
        x_bf = x_ref[0].astype(jnp.bfloat16)                               # [TQ, D]
        q_all = jnp.dot(x_bf, wq_ref[...],
                        preferred_element_type=jnp.float32)                # [TQ, d_inner]
        for hh in range(n_heads):                                          # static head scatter
            q_scr[hh] = q_all[:, hh * d_head:(hh + 1) * d_head].astype(jnp.bfloat16)

    # Per-head attention core (K already transposed -> natural MXU contraction).
    sim = jnp.dot(q_scr[h], kT_ref[0, 0],
                  preferred_element_type=jnp.float32)                      # [TQ, Mp]
    if m_true < m_pad:                                                     # mask padded keys
        key_id = jax.lax.broadcasted_iota(jnp.int32, sim.shape, 1)
        sim = jnp.where(key_id < m_true, sim, -1e30)
    sim = sim - jnp.max(sim, axis=-1, keepdims=True)
    p = jnp.exp(sim)
    p = p * pl.reciprocal(jnp.sum(p, axis=-1, keepdims=True), approx=True)
    av_scr[h] = jnp.dot(p.astype(jnp.bfloat16), v_ref[0, 0],
                        preferred_element_type=jnp.float32).astype(jnp.bfloat16)

    @pl.when(h == pl.num_programs(2) - 1)
    def _():
        av_full = jnp.concatenate([av_scr[hh] for hh in range(n_heads)], axis=-1)
        attn = jnp.dot(av_full, wo_ref[...],
                       preferred_element_type=jnp.float32)                 # [TQ, D]
        y = x_ref[0].astype(jnp.float32) + attn + bo_ref[0]
        mean = jnp.mean(y, axis=-1, keepdims=True)
        var = jnp.mean((y - mean) ** 2, axis=-1, keepdims=True)
        yn = (y - mean) * jax.lax.rsqrt(var + eps)
        o_ref[0] = (yn * g_ref[0] + b_ref[0]).astype(o_ref.dtype)


def attn_add_ln(x, kT, v, wq, wo, bo, gamma, beta, *, m_true, tq):
    B, N, D = x.shape
    _, n_heads, d_head, Mp = kT.shape
    d_inner = n_heads * d_head
    kernel = functools.partial(_attn_ln_kernel, n_heads=n_heads, d_head=d_head,
                               eps=1e-5, m_true=m_true, m_pad=Mp)
    return pl.pallas_call(
        kernel,
        out_shape=jax.ShapeDtypeStruct((B, N, D), x.dtype),
        grid_spec=pltpu.PrefetchScalarGridSpec(
            num_scalar_prefetch=0, grid=(B, N // tq, n_heads),
            in_specs=[
                pl.BlockSpec((1, tq, D), lambda b, i, h: (b, i, 0)),
                pl.BlockSpec((1, 1, d_head, Mp), lambda b, i, h: (b, h, 0, 0)),
                pl.BlockSpec((1, 1, Mp, d_head), lambda b, i, h: (b, h, 0, 0)),
                pl.BlockSpec((D, d_inner), lambda b, i, h: (0, 0)),
                pl.BlockSpec((d_inner, D), lambda b, i, h: (0, 0)),
                pl.BlockSpec((1, D), lambda b, i, h: (0, 0)),
                pl.BlockSpec((1, D), lambda b, i, h: (0, 0)),
                pl.BlockSpec((1, D), lambda b, i, h: (0, 0)),
            ],
            out_specs=pl.BlockSpec((1, tq, D), lambda b, i, h: (b, i, 0)),
            scratch_shapes=[
                pltpu.VMEM((n_heads, tq, d_head), jnp.bfloat16),   # cached Q (per head)
                pltpu.VMEM((n_heads, tq, d_head), jnp.bfloat16),   # per-head softmax(QK)V
            ],
        ),
        compiler_params=pltpu.CompilerParams(
            dimension_semantics=("parallel", "parallel", "arbitrary"),
            vmem_limit_bytes=_vmem_budget()),
    )(x, kT, v, wq, wo, bo, gamma, beta)


# ----------------------------------------------------------------------------
# Kernel 2: fused  y = LayerNorm(x + GEGLU-FFN(x))
#   Hidden dim H is a reduction grid axis.  W1 is re-packed so each H-tile holds
#   [Wa_k | Wg_k]: a single full-width matmul per step, 128-aligned a/gate slices.
# ----------------------------------------------------------------------------
def _ffn_ln_kernel(x_ref, w1_ref, b1_ref, w2_ref, b2_ref, g_ref, b_ref, o_ref,
                   acc_ref, *, th, eps):
    kk = pl.program_id(2)

    @pl.when(kk == 0)
    def _():
        acc_ref[...] = jnp.zeros_like(acc_ref)

    x_bf = x_ref[0].astype(jnp.bfloat16)                                   # [TQ, D]
    ag = jnp.dot(x_bf, w1_ref[...],
                 preferred_element_type=jnp.float32) + b1_ref[0]           # [TQ, 2*TH]
    a = ag[:, :th]
    gate = ag[:, th:]
    gelu = 0.5 * gate * (1.0 + jax.lax.erf(gate * (1.0 / math.sqrt(2.0))))  # exact nn.GELU()
    hidden = (a * gelu).astype(jnp.bfloat16)                               # [TQ, TH]
    acc_ref[...] += jnp.dot(hidden, w2_ref[...], preferred_element_type=jnp.float32)

    @pl.when(kk == pl.num_programs(2) - 1)
    def _():
        y = x_ref[0].astype(jnp.float32) + acc_ref[...] + b2_ref[0]
        mean = jnp.mean(y, axis=-1, keepdims=True)
        var = jnp.mean((y - mean) ** 2, axis=-1, keepdims=True)
        yn = (y - mean) * jax.lax.rsqrt(var + eps)
        o_ref[0] = (yn * g_ref[0] + b_ref[0]).astype(o_ref.dtype)


def ffn_add_ln(x, w1p, b1p, w2, b2, gamma, beta, *, tq, th):
    B, N, D = x.shape
    H = w2.shape[0]
    kernel = functools.partial(_ffn_ln_kernel, th=th, eps=1e-5)
    return pl.pallas_call(
        kernel,
        out_shape=jax.ShapeDtypeStruct((B, N, D), x.dtype),
        grid_spec=pltpu.PrefetchScalarGridSpec(
            num_scalar_prefetch=0, grid=(B, N // tq, H // th),
            in_specs=[
                pl.BlockSpec((1, tq, D), lambda b, i, k: (b, i, 0)),
                pl.BlockSpec((D, 2 * th), lambda b, i, k: (0, k)),
                pl.BlockSpec((1, 2 * th), lambda b, i, k: (0, k)),
                pl.BlockSpec((th, D), lambda b, i, k: (k, 0)),
                pl.BlockSpec((1, D), lambda b, i, k: (0, 0)),
                pl.BlockSpec((1, D), lambda b, i, k: (0, 0)),
                pl.BlockSpec((1, D), lambda b, i, k: (0, 0)),
            ],
            out_specs=pl.BlockSpec((1, tq, D), lambda b, i, k: (b, i, 0)),
            scratch_shapes=[pltpu.VMEM((tq, D), jnp.float32)],
        ),
        compiler_params=pltpu.CompilerParams(
            dimension_semantics=("parallel", "parallel", "arbitrary"),
            vmem_limit_bytes=_vmem_budget()),
    )(x, w1p, b1p, w2, b2, gamma, beta)


# ----------------------------------------------------------------------------
# One-time weight packing (hoisted out of the per-call wrapper).
# ----------------------------------------------------------------------------
def pack_block_params(p, *, n_heads, d_head, th=512):
    bf16 = jnp.bfloat16
    d_model = p["sa_wq"].shape[0]
    d_inner = n_heads * d_head
    assert p["sa_wq"].shape[1] == d_inner
    scale = 1.0 / math.sqrt(d_head)          # folded into Wq once (mathematically identical)

    H = p["ff_w2"].shape[0]
    th_eff = _pick_tile(H, th)
    nk = H // th_eff
    wa = p["ff_w1"][:, :H].reshape(d_model, nk, th_eff)
    wg = p["ff_w1"][:, H:].reshape(d_model, nk, th_eff)
    w1_packed = jnp.concatenate([wa, wg], axis=2).reshape(d_model, 2 * H).astype(bf16)
    ba = p["ff_b1"][:, :H].reshape(1, nk, th_eff)
    bg = p["ff_b1"][:, H:].reshape(1, nk, th_eff)
    b1_packed = jnp.concatenate([ba, bg], axis=2).reshape(1, 2 * H).astype(jnp.float32)

    return {
        "n_heads": n_heads, "d_head": d_head, "ff_th": th_eff,
        # self-attention
        "sa_wq": (p["sa_wq"] * scale).astype(bf16),
        "sa_wkv": jnp.concatenate([p["sa_wk"], p["sa_wv"]], axis=1).astype(bf16),
        "sa_wo": p["sa_wo"].astype(bf16),
        "sa_bo": p["sa_bo"].astype(jnp.float32),
        "ln1_g": p["ln1_g"].astype(jnp.float32), "ln1_b": p["ln1_b"].astype(jnp.float32),
        # cross-attention
        "ca_wq": (p["ca_wq"] * scale).astype(bf16),
        "ca_wkv": jnp.concatenate([p["ca_wk"], p["ca_wv"]], axis=1).astype(bf16),
        "ca_wo": p["ca_wo"].astype(bf16),
        "ca_bo": p["ca_bo"].astype(jnp.float32),
        "ln2_g": p["ln2_g"].astype(jnp.float32), "ln2_b": p["ln2_b"].astype(jnp.float32),
        # feed-forward
        "ff_w1": w1_packed, "ff_b1": b1_packed,
        "ff_w2": p["ff_w2"].astype(bf16), "ff_b2": p["ff_b2"].astype(jnp.float32),
        "ln3_g": p["ln3_g"].astype(jnp.float32), "ln3_b": p["ln3_b"].astype(jnp.float32),
    }


# ----------------------------------------------------------------------------
# Block wrapper
# ----------------------------------------------------------------------------
def basic_transformer_block(x, context, packed, *, tq=None, tkv=512):
    B, N, D = x.shape
    n_heads, d_head = packed["n_heads"], packed["d_head"]

    if tq is None:                                   # bigger query tiles on 128 MiB parts
        tq = 512 if _vmem_budget() >= 96 * 1024 * 1024 else 256
    tq_eff = _pick_tile(N, tq)

    # ---- x = norm1(x + self_attn(x)) ----
    n_pad = _round_up(N, 128)
    x_keys = x if n_pad == N else jnp.pad(x, ((0, 0), (0, n_pad - N), (0, 0)))
    k_sa, v_sa = kv_project(x_keys, packed["sa_wkv"], n_heads=n_heads, d_head=d_head,
                            tm=_pick_tile(n_pad, tkv))
    x = attn_add_ln(x, k_sa, v_sa, packed["sa_wq"], packed["sa_wo"], packed["sa_bo"],
                    packed["ln1_g"], packed["ln1_b"], m_true=N, tq=tq_eff)

    # ---- x = norm2(x + cross_attn(x, context)) ----
    M = context.shape[1]
    m_pad = _round_up(M, 128)
    ctx_keys = context if m_pad == M else jnp.pad(context, ((0, 0), (0, m_pad - M), (0, 0)))
    k_ca, v_ca = kv_project(ctx_keys, packed["ca_wkv"], n_heads=n_heads, d_head=d_head,
                            tm=_pick_tile(m_pad, tkv))
    x = attn_add_ln(x, k_ca, v_ca, packed["ca_wq"], packed["ca_wo"], packed["ca_bo"],
                    packed["ln2_g"], packed["ln2_b"], m_true=M, tq=tq_eff)

    # ---- x = norm3(x + ffn(x)) ----
    x = ffn_add_ln(x, packed["ff_w1"], packed["ff_b1"], packed["ff_w2"], packed["ff_b2"],
                   packed["ln3_g"], packed["ln3_b"], tq=tq_eff, th=packed["ff_th"])
    return x


# ----------------------------------------------------------------------------
# Pure-JAX f32 reference (same math) for a sanity check
# ----------------------------------------------------------------------------
def _ref_attn(x, ctx, wq, wk, wv, wo, bo, n_heads, d_head):
    B, N, _ = x.shape
    M = ctx.shape[1]
    q = (x @ wq).reshape(B, N, n_heads, d_head).transpose(0, 2, 1, 3)
    k = (ctx @ wk).reshape(B, M, n_heads, d_head).transpose(0, 2, 1, 3)
    v = (ctx @ wv).reshape(B, M, n_heads, d_head).transpose(0, 2, 1, 3)
    sim = jnp.einsum("bhnd,bhmd->bhnm", q, k) / math.sqrt(d_head)
    attn = jax.nn.softmax(sim, axis=-1)
    o = jnp.einsum("bhnm,bhmd->bhnd", attn, v).transpose(0, 2, 1, 3).reshape(B, N, -1)
    return o @ wo + bo[0]


def _ref_ln(y, g, b, eps=1e-5):
    mean = jnp.mean(y, axis=-1, keepdims=True)
    var = jnp.mean((y - mean) ** 2, axis=-1, keepdims=True)
    return (y - mean) * jax.lax.rsqrt(var + eps) * g[0] + b[0]


def reference_block(x, context, p, n_heads, d_head):
    x = _ref_ln(x + _ref_attn(x, x, p["sa_wq"], p["sa_wk"], p["sa_wv"],
                              p["sa_wo"], p["sa_bo"], n_heads, d_head),
                p["ln1_g"], p["ln1_b"])
    x = _ref_ln(x + _ref_attn(x, context, p["ca_wq"], p["ca_wk"], p["ca_wv"],
                              p["ca_wo"], p["ca_bo"], n_heads, d_head),
                p["ln2_g"], p["ln2_b"])
    proj = x @ p["ff_w1"] + p["ff_b1"][0]
    H = p["ff_w2"].shape[0]
    a, gate = proj[..., :H], proj[..., H:]
    h = a * (0.5 * gate * (1.0 + jax.lax.erf(gate / math.sqrt(2.0))))
    ff = h @ p["ff_w2"] + p["ff_b2"][0]
    return _ref_ln(x + ff, p["ln3_g"], p["ln3_b"])


# ----------------------------------------------------------------------------
if __name__ == "__main__":
    # Small shapes consistent with the module's forward (lane-dense d_model)
    B, H_sp, W_sp = 2, 8, 8
    N = H_sp * W_sp             # tokens (height*width) = 64
    d_model = 128
    n_heads = 4
    d_head = 32
    d_inner = n_heads * d_head  # == d_model here
    M = 16                      # context seq_len (padded to 128 for keys)
    context_dim = 96
    d_ff = 4 * d_model          # GEGLU hidden

    key = jax.random.PRNGKey(0)
    ks = jax.random.split(key, 16)
    init = lambda k, shape, s=0.02: (s * jax.random.normal(k, shape)).astype(jnp.float32)

    params = {
        # self-attention (context_dim == d_model)
        "sa_wq": init(ks[0], (d_model, d_inner)),
        "sa_wk": init(ks[1], (d_model, d_inner)),
        "sa_wv": init(ks[2], (d_model, d_inner)),
        "sa_wo": init(ks[3], (d_inner, d_model)),
        "sa_bo": init(ks[4], (1, d_model)),
        "ln1_g": jnp.ones((1, d_model), jnp.float32),
        "ln1_b": jnp.zeros((1, d_model), jnp.float32),
        # cross-attention
        "ca_wq": init(ks[5], (d_model, d_inner)),
        "ca_wk": init(ks[6], (context_dim, d_inner)),
        "ca_wv": init(ks[7], (context_dim, d_inner)),
        "ca_wo": init(ks[8], (d_inner, d_model)),
        "ca_bo": init(ks[9], (1, d_model)),
        "ln2_g": jnp.ones((1, d_model), jnp.float32),
        "ln2_b": jnp.zeros((1, d_model), jnp.float32),
        # feed-forward (GEGLU)
        "ff_w1": init(ks[10], (d_model, 2 * d_ff)),
        "ff_b1": init(ks[11], (1, 2 * d_ff)),
        "ff_w2": init(ks[12], (d_ff, d_model)),
        "ff_b2": init(ks[13], (1, d_model)),
        "ln3_g": jnp.ones((1, d_model), jnp.float32),
        "ln3_b": jnp.zeros((1, d_model), jnp.float32),
    }

    x = jax.random.normal(ks[14], (B, N, d_model), jnp.float32)
    context = jax.random.normal(ks[15], (B, M, context_dim), jnp.float32)

    # One-time weight packing (would live at model init in a real pipeline).
    packed = pack_block_params(params, n_heads=n_heads, d_head=d_head, th=256)

    # tq=32 / th=256 exercise the token-tiled grid, the head-reduction axis and the
    # FFN hidden-dim reduction axis at toy shapes.
    out = basic_transformer_block(x, context, packed, tq=32)
    out = jax.block_until_ready(out)

    ref = reference_block(x, context, params, n_heads, d_head)
    assert out.shape == (B, N, d_model)
    max_err = float(jnp.max(jnp.abs(out - ref)))
    assert jnp.allclose(out, ref, atol=2e-2, rtol=2e-2), f"mismatch vs reference (max err {max_err})"

    print("KERNEL_OK")
</pallas_src>

<mosaic_0001>
module attributes {stable_mosaic.version = 11 : i64} {
  func.func @_kv_proj_kernel(%arg0: i32, %arg1: i32, %arg2: memref<1x128x128xf32, #tpu.memory_space<vmem>>, %arg3: memref<128x256xbf16, #tpu.memory_space<vmem>>, %arg4: memref<1x4x32x128xbf16, #tpu.memory_space<vmem>>, %arg5: memref<1x4x128x32xbf16, #tpu.memory_space<vmem>>) attributes {dimension_semantics = [#tpu.dimension_semantics<parallel>, #tpu.dimension_semantics<parallel>], iteration_bounds = array<i64: 2, 1>, scalar_prefetch = 0 : i64, scratch_operands = 0 : i64, tpu.core_type = #tpu.core_type<tc>, window_params = [{transform_indices = @transform_0, window_bounds = array<i64: 1, 128, 128>}, {pipeline_mode = #tpu.pipeline_mode<synchronous>, transform_indices = @transform_1, window_bounds = array<i64: 128, 256>}, {transform_indices = @transform_2, window_bounds = array<i64: 1, 4, 32, 128>}, {transform_indices = @transform_3, window_bounds = array<i64: 1, 4, 128, 32>}]} {
    %c0 = arith.constant 0 : index
    %c0_0 = arith.constant 0 : index
    %c0_1 = arith.constant 0 : index
    %0 = vector.load %arg2[%c0, %c0_0, %c0_1] : memref<1x128x128xf32, #tpu.memory_space<vmem>>, vector<1x128x128xf32>
    %1 = vector.shape_cast %0 : vector<1x128x128xf32> to vector<128x128xf32>
    %2 = arith.truncf %1 : vector<128x128xf32> to vector<128x128xbf16>
    %c0_2 = arith.constant 0 : index
    %c0_3 = arith.constant 0 : index
    %3 = vector.load %arg3[%c0_2, %c0_3] : memref<128x256xbf16, #tpu.memory_space<vmem>>, vector<128x256xbf16>
    %cst = arith.constant dense<0.000000e+00> : vector<128x256xf32>
    %4 = tpu.matmul %2, %3, %cst {dimension_numbers = #tpu.dot_dimension_numbers<[1], [0], [0], [1], [0, 0, 1, 1], [], []>} : vector<128x128xbf16>, vector<128x256xbf16>, vector<128x256xf32> -> vector<128x256xf32>
    %5 = vector.extract_strided_slice %4 {offsets = [0, 0], sizes = [128, 128], strides = [1, 1]} : vector<128x256xf32> to vector<128x128xf32>
    %6 = tpu.transpose %5, [1, 0] : vector<128x128xf32> -> vector<128x128xf32>
    %7 = vector.extract_strided_slice %6 {offsets = [0, 0], sizes = [32, 128], strides = [1, 1]} : vector<128x128xf32> to vector<32x128xf32>
    %8 = arith.truncf %7 : vector<32x128xf32> to vector<32x128xbf16>
    %c0_4 = arith.constant 0 : index
    %c0_5 = arith.constant 0 : index
    %c0_6 = arith.constant 0 : index
    %c0_7 = arith.constant 0 : index
    %9 = vector.load %arg4[%c0_4, %c0_5, %c0_6, %c0_7] : memref<1x4x32x128xbf16, #tpu.memory_space<vmem>>, vector<1x1x32x128xbf16>
    %10 = vector.shape_cast %9 : vector<1x1x32x128xbf16> to vector<32x128xbf16>
    %11 = vector.shape_cast %8 : vector<32x128xbf16> to vector<1x1x32x128xbf16>
    tpu.vector_store %arg4[%c0_4, %c0_5, %c0_6, %c0_7], %11 {strides = array<i32>} : memref<1x4x32x128xbf16, #tpu.memory_space<vmem>>, vector<1x1x32x128xbf16>,
    %12 = vector.extract_strided_slice %4 {offsets = [0, 128], sizes = [128, 32], strides = [1, 1]} : vector<128x256xf32> to vector<128x32xf32>
    %13 = arith.truncf %12 : vector<128x32xf32> to vector<128x32xbf16>
    %c0_8 = arith.constant 0 : index
    %c0_9 = arith.constant 0 : index
    %c0_10 = arith.constant 0 : index
    %c0_11 = arith.constant 0 : index
    %14 = vector.load %arg5[%c0_8, %c0_9, %c0_10, %c0_11] : memref<1x4x128x32xbf16, #tpu.memory_space<vmem>>, vector<1x1x128x32xbf16>
    %15 = vector.shape_cast %14 : vector<1x1x128x32xbf16> to vector<128x32xbf16>
    %16 = vector.shape_cast %13 : vector<128x32xbf16> to vector<1x1x128x32xbf16>
    tpu.vector_store %arg5[%c0_8, %c0_9, %c0_10, %c0_11], %16 {strides = array<i32>} : memref<1x4x128x32xbf16, #tpu.memory_space<vmem>>, vector<1x1x128x32xbf16>,
    %17 = vector.extract_strided_slice %6 {offsets = [32, 0], sizes = [32, 128], strides = [1, 1]} : vector<128x128xf32> to vector<32x128xf32>
    %18 = arith.truncf %17 : vector<32x128xf32> to vector<32x128xbf16>
    %c0_12 = arith.constant 0 : index
    %c1 = arith.constant 1 : index
    %c0_13 = arith.constant 0 : index
    %c0_14 = arith.constant 0 : index
    %19 = vector.load %arg4[%c0_12, %c1, %c0_13, %c0_14] : memref<1x4x32x128xbf16, #tpu.memory_space<vmem>>, vector<1x1x32x128xbf16>
    %20 = vector.shape_cast %19 : vector<1x1x32x128xbf16> to vector<32x128xbf16>
    %21 = vector.shape_cast %18 : vector<32x128xbf16> to vector<1x1x32x128xbf16>
    tpu.vector_store %arg4[%c0_12, %c1, %c0_13, %c0_14], %21 {strides = array<i32>} : memref<1x4x32x128xbf16, #tpu.memory_space<vmem>>, vector<1x1x32x128xbf16>,
    %22 = vector.extract_strided_slice %4 {offsets = [0, 160], sizes = [128, 32], strides = [1, 1]} : vector<128x256xf32> to vector<128x32xf32>
    %23 = arith.truncf %22 : vector<128x32xf32> to vector<128x32xbf16>
    %c0_15 = arith.constant 0 : index
    %c1_16 = arith.constant 1 : index
    %c0_17 = arith.constant 0 : index
    %c0_18 = arith.constant 0 : index
    %24 = vector.load %arg5[%c0_15, %c1_16, %c0_17, %c0_18] : memref<1x4x128x32xbf16, #tpu.memory_space<vmem>>, vector<1x1x128x32xbf16>
    %25 = vector.shape_cast %24 : vector<1x1x128x32xbf16> to vector<128x32xbf16>
    %26 = vector.shape_cast %23 : vector<128x32xbf16> to vector<1x1x128x32xbf16>
    tpu.vector_store %arg5[%c0_15, %c1_16, %c0_17, %c0_18], %26 {strides = array<i32>} : memref<1x4x128x32xbf16, #tpu.memory_space<vmem>>, vector<1x1x128x32xbf16>,
    %27 = vector.extract_strided_slice %6 {offsets = [64, 0], sizes = [32, 128], strides = [1, 1]} : vector<128x128xf32> to vector<32x128xf32>
    %28 = arith.truncf %27 : vector<32x128xf32> to vector<32x128xbf16>
    %c0_19 = arith.constant 0 : index
    %c2 = arith.constant 2 : index
    %c0_20 = arith.constant 0 : index
    %c0_21 = arith.constant 0 : index
    %29 = vector.load %arg4[%c0_19, %c2, %c0_20, %c0_21] : memref<1x4x32x128xbf16, #tpu.memory_space<vmem>>, vector<1x1x32x128xbf16>
    %30 = vector.shape_cast %29 : vector<1x1x32x128xbf16> to vector<32x128xbf16>
    %31 = vector.shape_cast %28 : vector<32x128xbf16> to vector<1x1x32x128xbf16>
    tpu.vector_store %arg4[%c0_19, %c2, %c0_20, %c0_21], %31 {strides = array<i32>} : memref<1x4x32x128xbf16, #tpu.memory_space<vmem>>, vector<1x1x32x128xbf16>,
    %32 = vector.extract_strided_slice %4 {offsets = [0, 192], sizes = [128, 32], strides = [1, 1]} : vector<128x256xf32> to vector<128x32xf32>
    %33 = arith.truncf %32 : vector<128x32xf32> to vector<128x32xbf16>
    %c0_22 = arith.constant 0 : index
    %c2_23 = arith.constant 2 : index
    %c0_24 = arith.constant 0 : index
    %c0_25 = arith.constant 0 : index
    %34 = vector.load %arg5[%c0_22, %c2_23, %c0_24, %c0_25] : memref<1x4x128x32xbf16, #tpu.memory_space<vmem>>, vector<1x1x128x32xbf16>
    %35 = vector.shape_cast %34 : vector<1x1x128x32xbf16> to vector<128x32xbf16>
    %36 = vector.shape_cast %33 : vector<128x32xbf16> to vector<1x1x128x32xbf16>
    tpu.vector_store %arg5[%c0_22, %c2_23, %c0_24, %c0_25], %36 {strides = array<i32>} : memref<1x4x128x32xbf16, #tpu.memory_space<vmem>>, vector<1x1x128x32xbf16>,
    %37 = vector.extract_strided_slice %6 {offsets = [96, 0], sizes = [32, 128], strides = [1, 1]} : vector<128x128xf32> to vector<32x128xf32>
    %38 = arith.truncf %37 : vector<32x128xf32> to vector<32x128xbf16>
    %c0_26 = arith.constant 0 : index
    %c3 = arith.constant 3 : index
    %c0_27 = arith.constant 0 : index
    %c0_28 = arith.constant 0 : index
    %39 = vector.load %arg4[%c0_26, %c3, %c0_27, %c0_28] : memref<1x4x32x128xbf16, #tpu.memory_space<vmem>>, vector<1x1x32x128xbf16>
    %40 = vector.shape_cast %39 : vector<1x1x32x128xbf16> to vector<32x128xbf16>
    %41 = vector.shape_cast %38 : vector<32x128xbf16> to vector<1x1x32x128xbf16>
    tpu.vector_store %arg4[%c0_26, %c3, %c0_27, %c0_28], %41 {strides = array<i32>} : memref<1x4x32x128xbf16, #tpu.memory_space<vmem>>, vector<1x1x32x128xbf16>,
    %42 = vector.extract_strided_slice %4 {offsets = [0, 224], sizes = [128, 32], strides = [1, 1]} : vector<128x256xf32> to vector<128x32xf32>
    %43 = arith.truncf %42 : vector<128x32xf32> to vector<128x32xbf16>
    %c0_29 = arith.constant 0 : index
    %c3_30 = arith.constant 3 : index
    %c0_31 = arith.constant 0 : index
    %c0_32 = arith.constant 0 : index
    %44 = vector.load %arg5[%c0_29, %c3_30, %c0_31, %c0_32] : memref<1x4x128x32xbf16, #tpu.memory_space<vmem>>, vector<1x1x128x32xbf16>
    %45 = vector.shape_cast %44 : vector<1x1x128x32xbf16> to vector<128x32xbf16>
    %46 = vector.shape_cast %43 : vector<128x32xbf16> to vector<1x1x128x32xbf16>
    tpu.vector_store %arg5[%c0_29, %c3_30, %c0_31, %c0_32], %46 {strides = array<i32>} : memref<1x4x128x32xbf16, #tpu.memory_space<vmem>>, vector<1x1x128x32xbf16>,
    return
  }
  func.func @transform_0(%arg0: i32, %arg1: i32) -> (i32, i32, i32) {
    %c0_i32 = arith.constant 0 : i32
    %c0_i32_0 = arith.constant 0 : i32
    return %arg0, %arg1, %c0_i32 : i32, i32, i32
  }
  func.func @transform_1(%arg0: i32, %arg1: i32) -> (i32, i32) {
    %c0_i32 = arith.constant 0 : i32
    %c0_i32_0 = arith.constant 0 : i32
    %c0_i32_1 = arith.constant 0 : i32
    return %c0_i32, %c0_i32_0 : i32, i32
  }
  func.func @transform_2(%arg0: i32, %arg1: i32) -> (i32, i32, i32, i32) {
    %c0_i32 = arith.constant 0 : i32
    %c0_i32_0 = arith.constant 0 : i32
    %c0_i32_1 = arith.constant 0 : i32
    return %arg0, %c0_i32, %c0_i32_0, %arg1 : i32, i32, i32, i32
  }
  func.func @transform_3(%arg0: i32, %arg1: i32) -> (i32, i32, i32, i32) {
    %c0_i32 = arith.constant 0 : i32
    %c0_i32_0 = arith.constant 0 : i32
    %c0_i32_1 = arith.constant 0 : i32
    return %arg0, %c0_i32, %arg1, %c0_i32_0 : i32, i32, i32, i32
  }
}

</mosaic_0001>

<bundles_post_ra>
// kernel: tpu_custom_call.1
= control target key start
LH: loop header
LB: loop body
LE: loop exit
PB: predicated region body
PF: predicated region fallthrough
CT: control target
= control target key end

     0   :  { %9 = vsyncpa [#allocation3], 0  ;;  %s2123_s0 = inlined_call_operand.hbm [shape: f32[2,128,128], index: 0, kind: input, shape index: {}]   ;;  %s2124_s1 = inlined_call_operand.hbm [shape: bf16[128,256], index: 1, kind: input, shape index: {}]   ;;  %s2125_s2 = inlined_call_operand.hbm [shape: bf16[2,4,32,128], index: 2, kind: output, shape index: {0}]   ;;  %s2126_s3 = inlined_call_operand.hbm [shape: bf16[2,4,128,32], index: 3, kind: output, shape index: {1}]  }
   0x1   :  { %11 = vsyncpa [#allocation3 + $0x1], 0 }
   0x2   :  { %12 = vsyncpa [#allocation6], 0 }
   0x3   :  { %13 = vsyncpa [#allocation4], 0 }
   0x4   :  { %15 = vsyncpa [#allocation4 + $0x1], 0 }
   0x5   :  { %16 = vsyncpa [#allocation9], 0 }
   0x6   :  { %18 = vsyncpa [#allocation9 + $0x1], 0  ;;  %s1576_s12 = smov 0   ;;  %s1578_s13 = smov 0  }
   0x7   :  { %s1580_s14 = smov 0   ;;  %s1582_s15 = smov 0  }
   0x8   :  { %s1584_s16 = smov 0   ;;  %s1586_s17 = smov 0  }
   0x9 LB: > { %s1031_s18 = sadd.s32 4294967295, %s1543_s17   ;;  %s1032_s19 = sadd.s32 4294967294, %s1543_s17   ;;  %s1543_s17 = sphi %s1586_s17, %s24_s17   ;;  %s1539_s16 = sphi %s1584_s16, %s2150_s16   ;;  %s1535_s15 = sphi %s1582_s15, %s2149_s15   ;;  %s1531_s14 = sphi %s1580_s14, %s2148_s14   ;;  %s1527_s13 = sphi %s1578_s13, %s2147_s13   ;;  %s1523_s12 = sphi %s1576_s12, %s2146_s12  }
   0xa   : > { %p58_p0 = scmp.ne.s32.totalorder %s1527_s13, %s1523_s12  ;;  %p1610_p1 = scmp.eq.s32.totalorder %s1031_s18, 0 }
   0xb   : > { %p1614_p2 = scmp.eq.s32.totalorder %s1031_s18, 1  ;;  %p111_p3 = scmp.eq.s32.totalorder %s1032_s19, 1 }
   0xc   : > { %s2131_s20 = scalar_select %p1610_p1, 1, 0 }
   0xd   : > { %s2132_s21 = scalar_select %p1614_p2, 1, 0 }
   0xe   : > { %p1620_p4 = por %p1610_p1, %p58_p0  ;;  %p1033_p5 = scmp.ge.s32.totalorder %s1543_s17, 1 }
   0xf   : > { %p1625_p6 = por %p111_p3, %p58_p0  ;;  %p146_p7 = scmp.lt.s32.totalorder %s1543_s17, 3 }
  0x10   : > { %s2133_s22 = scalar_select %p1620_p4, 1, 0 }
  0x11   : > { %s2134_s23 = scalar_select %p1625_p6, 1, 0 }
  0x12   : > { %p1630_p8 = pnand %p1033_p5, %p146_p7  ;;  %s1545_s25 = smov [#allocation5]  }
  0x13   : > { %s158_s26 = sshll.u32 %s1545_s25, 4  ;;  %s36_s28 = sadd.s32 1, %s1539_s16  ;;  %s159_s26 = int_to_ptr.vmem [resolvable:$true] %s158_s26 }
  0x14   : > { %s2135_s24 = scalar_select %p1630_p8, 1, 0 }
  0x15   : > { %p1268_p9 = pneg %p1630_p8  ;;  %s1367_s4 = scalar_lea.hbm %s2124_s1, 2048 }
  0x16   : > { %p1368_p12 = scmp.ne.s32.totalorder %s2124_s1, %s1367_s4  ;;  %p1374_p5 = scmp.lt.u32.totalorder %s1367_s4, %s2124_s1 }
  0x17   : > { %p1639_p11 = pnand %p1268_p9, %p1610_p1 }
  0x19   : > { %p1369_p13 = pneg %p1639_p11 }
  0x1b   : > { %p1370_p0 = pnand %p1369_p13, %p1368_p12 }
  0x1d   : > { %p1371_p3 = pneg %p1370_p0 }
  0x1f   : > { %p1376_p7 = pnand %p1374_p5, %p1371_p3 }
  0x21   : > { %1379 = shalt.err (!%p1376_p7)
}
  0x22   : > { %s1380_s9 = scalar_lea.vmem %s159_s26, 2048  ;;  %p1388_p1 = scmp.lt.s32.totalorder %s159_s26, %s159_s26 }
  0x23   : > { %p1381_p9 = scmp.ne.s32.totalorder %s159_s26, %s1380_s9  ;;  %p1389_p4 = scmp.lt.s32.totalorder %s1380_s9, %s1380_s9 }
  0x25   : > { %p1383_p10 = pnand %p1381_p9, %p1369_p13  ;;  %p1390_p8 = por %p1389_p4, %p1388_p1 }
  0x27   : > { %p1384_p6 = pneg %p1383_p10 }
  0x29   : > { %p1391_p2 = pnand %p1390_p8, %p1384_p6 }
  0x2b   : > { %1394 = shalt.err (!%p1391_p2)
}
  0x2c   : > { %s1546_s10 = smov 128   ;;  %s1547_s11 = smov 8  }
  0x2d   : > { %1271 = dma.hbm_to_vmem [thread:$0]  (!%p1639_p11), %s2124_s1, 2048, %s159_s26, [#allocation6], %s1546_s10, %s1546_s10, %s1547_s11  }
  0x2e   : > { %p38_p1 = scmp.ge.s32.totalorder %s36_s28, 2  ;;  %s45_s25 = sadd.s32 1, %s1531_s14 }
  0x2f   : > { %p52_p2 = scmp.ne.s32.totalorder %s1531_s14, %s1527_s13  ;;  %p53_p4 = scmp.eq.s32.totalorder %s1543_s17, 0 }
  0x30   : > { %s2152_s28 = smov (%p38_p1, %s36_s28), 0  ;;  %p2138_p8 = scmp.ne.s32.totalorder %s2132_s21, 0 }
  0x31   : > { %p1669_p6 = por %p53_p4, %p52_p2  ;;  %s40_s30 = ssub.s32 %s1539_s16, %s2152_s28 }
  0x32   : > { %p1675_p10 = por %p2138_p8, %p52_p2  ;;  %p1284_p12 = scmp.lt.s32.totalorder %s1543_s17, 2 }
  0x33   : > { %p43_p11 = scmp.eq.s32.totalorder %s40_s30, 0  ;;  %s172_s26 = sand.u32 1, %s1531_s14  }
  0x34   : > { %s1036_s4 = sshll.u32 %s172_s26, 7  ;;  %s1160_s6 = sshll.u32 %s1539_s16, 11 }
  0x35   : > { %s1684_s5 = scalar_select %p43_p11, %s1531_s14, %s45_s25  }
  0x36   : > { %s1690_s9 = scalar_lea.hbm %s2123_s0, %s1160_s6  ;;  %s176_s21 = scalar_lea.vmem [#allocation2], %s1036_s4 }
  0x37   : > { %s185_s18 = sshll.u32 %s176_s21, 4  ;;  %p1696_p13 = pnand %p1284_p12, %p1669_p6  ;;  %s1692_s18 = int_to_ptr.vmem [resolvable:$true] %s185_s18 }
  0x38   : > { %s1700_s25 = scalar_lea.sflag [#allocation3], %s172_s26  ;;  %s1395_s30 = scalar_lea.hbm %s1690_s9, 2048 }
  0x39   : > { %p1396_p0 = scmp.ne.s32.totalorder %s1690_s9, %s1395_s30  ;;  %p1397_p3 = pneg %p1696_p13 }
  0x3a   : > { %s1400_s29 = scalar_lea.hbm %s2123_s0, 4096  ;;  %p1401_p9 = scmp.lt.u32.totalorder %s1690_s9, %s2123_s0 }
  0x3b   : > { %p1398_p5 = pnand %p1397_p3, %p1396_p0  ;;  %p1402_p1 = scmp.lt.u32.totalorder %s1400_s29, %s1395_s30 }
  0x3c   : > { %p1404_p4 = scmp.lt.u32.totalorder %s1395_s30, %s1690_s9 }
  0x3d   : > { %p1399_p7 = pneg %p1398_p5  ;;  %p1403_p2 = por %p1402_p1, %p1401_p9 }
  0x3f   : > { %p1405_p6 = por %p1404_p4, %p1403_p2 }
  0x41   : > { %p1406_p8 = pnand %p1405_p6, %p1399_p7 }
  0x43   : > { %1409 = shalt.err (!%p1406_p8)
}
  0x44   : > { %s1410_s26 = scalar_lea.vmem %s1692_s18, 2048  ;;  %s1548_s21 = smov [#allocation2]  }
  0x45   : > { %p1411_p12 = scmp.ne.s32.totalorder %s1692_s18, %s1410_s26  ;;  %s1415_s4 = sshll.u32 %s1548_s21, 4  ;;  %s1416_s4 = int_to_ptr.vmem [resolvable:$false] %s1415_s4 }
  0x46   : > { %s1417_s6 = scalar_lea.vmem %s1416_s4, 4096  ;;  %p1418_p5 = scmp.lt.s32.totalorder %s1692_s18, %s1416_s4 }
  0x47   : > { %p1413_p11 = pnand %p1411_p12, %p1397_p3  ;;  %p1419_p9 = scmp.lt.s32.totalorder %s1417_s6, %s1410_s26 }
  0x49   : > { %p1414_p0 = pneg %p1413_p11  ;;  %p1420_p1 = por %p1419_p9, %p1418_p5 }
  0x4b   : > { %p1421_p2 = pnand %p1420_p1, %p1414_p0 }
  0x4d   : > { %1424 = shalt.err (!%p1421_p2)
}
  0x4e   : > { %1275 = dma.hbm_to_vmem [thread:$0]  (!%p1696_p13), %s1690_s9, 2048, %s1692_s18, %s1700_s25, %s1546_s10, %s1546_s10, %s1547_s11  }
  0x4f   : > { %p2141_p3 = scmp.ne.s32.totalorder %s2135_s24, 0 }
  0x50   : > { %s1734_s30 = sand.u32 (!%p2141_p3), 1, %s1527_s13   ;;  %p2142_p7 = scmp.ne.s32.totalorder (!%p2141_p3), %s2133_s22, 0 }
  0x51   : > { %197 = sbr.rel (%p2141_p3) target bundleno = 638 (0x27e), region = 28  ;;  %s1040_s29 = sshll.u32 (!%p2141_p3), %s1734_s30, 7 }
  0x52   : > { %s200_s7 = scalar_lea.sflag (!%p2141_p3), [#allocation3], %s1734_s30  ;;  %s1738_s8 = scalar_lea.vmem (!%p2141_p3), [#allocation2], %s1040_s29 }
  0x58   : > { %1506 = dma.done.wait (%p2142_p7), %s200_s7, 2048  }
  0x59   : > { %1508 = vsyncadd (%p2142_p7), %s200_s7, 4294965248  ;;  %p2143_p13 = scmp.ne.s32.totalorder %s2131_s20, 0 }
  0x5b   : > { %1510 = dma.done.wait (%p2143_p13), [#allocation6], 2048  }
  0x5c   : > { %1512 = vsyncadd (%p2143_p13), [#allocation6], 4294965248  ;;  %v1549_v0 = vmov 0   ;;  %v1343_v1 = vld [vmem:[#allocation5 + $0x4] ss:$8 sps:$4 sm:$0xff]   ;;  %v240_v23 = vld [vmem:[%s1738_s8 + $0x10] sm:$0xff] }
  0x5d   : > { %390 = vmatprep.mubr.bf16.mxu0 %v1549_v0  ;;  %430 = vmatprep.mubr.bf16.mxu1 %v1549_v0  ;;  %v1345_v2 = vld [vmem:[#allocation5] ss:$8 sps:$4 sm:$0xff]   ;;  %v1346_v3 = vld [vmem:[#allocation5 + $0x14] ss:$8 sps:$4 sm:$0xff]   ;;  %v1348_v4 = vld [vmem:[#allocation5 + $0x10] ss:$8 sps:$4 sm:$0xff]  }
  0x5e   : > { %358 = vmatprep.subr.bf16.mxu0 %v1343_v1  ;;  %1242 = vmatprep.subr.bf16.mxu1 %v1343_v1  ;;  %v1349_v5 = vld [vmem:[#allocation5 + $0x24] ss:$8 sps:$4 sm:$0xff]   ;;  %v1351_v6 = vld [vmem:[#allocation5 + $0x20] ss:$8 sps:$4 sm:$0xff]   ;;  %v1352_v7 = vld [vmem:[#allocation5 + $0x34] ss:$8 sps:$4 sm:$0xff]  }
  0x5f   : > { %359 = vmatpush1.bf16.msra.mxu0 %v1345_v2  ;;  %1250 = vmatpush1.bf16.msra.mxu1 %v1345_v2  ;;  %v1354_v8 = vld [vmem:[#allocation5 + $0x30] ss:$8 sps:$4 sm:$0xff]   ;;  %v1355_v9 = vld [vmem:[#allocation5 + $0x44] ss:$8 sps:$4 sm:$0xff]   ;;  %v1357_v10 = vld [vmem:[#allocation5 + $0x40] ss:$8 sps:$4 sm:$0xff]  }
  0x60   : > { %360 = vmatprep.subr.bf16.mxu0 %v1346_v3  ;;  %1243 = vmatprep.subr.bf16.mxu1 %v1346_v3  ;;  %v1358_v11 = vld [vmem:[#allocation5 + $0x54] ss:$8 sps:$4 sm:$0xff]   ;;  %v1360_v12 = vld [vmem:[#allocation5 + $0x50] ss:$8 sps:$4 sm:$0xff]   ;;  %v1361_v13 = vld [vmem:[#allocation5 + $0x64] ss:$8 sps:$4 sm:$0xff]  }
  0x61   : > { %v1363_v14 = vld [vmem:[#allocation5 + $0x60] ss:$8 sps:$4 sm:$0xff]   ;;  %v1364_v15 = vld [vmem:[#allocation5 + $0x74] ss:$8 sps:$4 sm:$0xff]   ;;  %v1366_v16 = vld [vmem:[#allocation5 + $0x70] ss:$8 sps:$4 sm:$0xff]  }
  0x62   : > { %v238_v17 = vld [vmem:[%s1738_s8] sm:$0xff]  ;;  %v239_v18 = vld [vmem:[%s1738_s8 + $0x8] sm:$0xff]  ;;  %v241_v24 = vld [vmem:[%s1738_s8 + $0x18] sm:$0xff]  ;;  %s1043_s20 = sshll.u32 %s1734_s30, 8  ;;  %vm587_vm0 = vcmask 257024   ;;  %s1550_s24 = smov 64  }
  0x63   : > { %361 = vmatpush1.bf16.msra.mxu0 %v1348_v4  ;;  %1251 = vmatpush1.bf16.msra.mxu1 %v1348_v4  ;;  %v246_v19 = vld [vmem:[%s1738_s8 + $0x40] sm:$0xff]  ;;  %v247_v20 = vld [vmem:[%s1738_s8 + $0x48] sm:$0xff]  ;;  %v254_v21 = vpack.c.bf16 %v239_v18, %v238_v17  ;;  %v248_v25 = vld [vmem:[%s1738_s8 + $0x50] sm:$0xff]  ;;  %v255_v27 = vpack.c.bf16 %v241_v24, %v240_v23  ;;  %s1781_s22 = scalar_lea.vmem [#allocation8], %s1043_s20  ;;  %s1551_s10 = smov 96  }
  0x64   : > { %362 = vmatprep.subr.bf16.mxu0 %v1349_v5  ;;  %1244 = vmatprep.subr.bf16.mxu1 %v1349_v5  ;;  %v258_v22 = vpack.c.bf16 %v247_v20, %v246_v19  ;;  %v249_v26 = vld [vmem:[%s1738_s8 + $0x58] sm:$0xff]  ;;  %v250_v29 = vld [vmem:[%s1738_s8 + $0x60] sm:$0xff]  ;;  %v251_v30 = vld [vmem:[%s1738_s8 + $0x68] sm:$0xff]  ;;  %s1552_s11 = smov 32   ;;  %s1042_s9 = sshll.u32 %s1734_s30, 6 }
  0x65   : > { %v259_v28 = vpack.c.bf16 %v249_v26, %v248_v25  ;;  %v242_v31 = vld [vmem:[%s1738_s8 + $0x20] sm:$0xff]  ;;  %v243_v32 = vld [vmem:[%s1738_s8 + $0x28] sm:$0xff]  ;;  %v260_v33 = vpack.c.bf16 %v251_v30, %v250_v29  ;;  %v252_v35 = vld [vmem:[%s1738_s8 + $0x70] sm:$0xff]  ;;  %s1986_s18 = scalar_lea.vmem [#allocation7], %s1042_s9  ;;  %s1193_s25 = sshll.u32 %s1535_s15, 10 }
  0x66   : > { %v256_v34 = vpack.c.bf16 %v243_v32, %v242_v31  ;;  %v253_v36 = vld [vmem:[%s1738_s8 + $0x78] sm:$0xff]  ;;  %v244_v37 = vld [vmem:[%s1738_s8 + $0x30] sm:$0xff]  ;;  %s882_s19 = sshll.u32 %s1986_s18, 4  ;;  %s2030_s4 = scalar_lea.hbm %s2125_s2, %s1193_s25  ;;  %s2023_s19 = int_to_ptr.vmem [resolvable:$true] %s882_s19 }
  0x67   : > { %363 = vmatpush1.bf16.msra.mxu0 %v1351_v6  ;;  %1252 = vmatpush1.bf16.msra.mxu1 %v1351_v6  ;;  %v245_v38 = vld [vmem:[%s1738_s8 + $0x38] sm:$0xff]  ;;  %v261_v39 = vpack.c.bf16 %v253_v36, %v252_v35  ;;  %s863_s6 = scalar_lea.sflag [#allocation4], %s1734_s30  ;;  %s1425_s29 = scalar_lea.vmem %s2023_s19, 1024 }
  0x68   : > { %364 = vmatprep.subr.bf16.mxu0 %v1352_v7  ;;  %1245 = vmatprep.subr.bf16.mxu1 %v1352_v7  ;;  %v257_v40 = vpack.c.bf16 %v245_v38, %v244_v37  ;;  %p1426_p4 = scmp.ne.s32.totalorder %s2023_s19, %s1425_s29  ;;  %s1553_s7 = smov [#allocation7]  }
  0x69   : > { %s1429_s8 = sshll.u32 %s1553_s7, 4  ;;  %s1430_s8 = int_to_ptr.vmem [resolvable:$false] %s1429_s8 }
  0x6a   : > { %p1427_p6 = pnand %p1426_p4, %p1675_p10  ;;  %s1431_s20 = scalar_lea.vmem %s1430_s8, 2048 }
  0x6b   : > { %365 = vmatpush1.bf16.msra.mxu0 %v1354_v8  ;;  %1253 = vmatpush1.bf16.msra.mxu1 %v1354_v8  ;;  %p1432_p12 = scmp.lt.s32.totalorder %s2023_s19, %s1430_s8  ;;  %p1433_p11 = scmp.lt.s32.totalorder %s1431_s20, %s1425_s29 }
  0x6c   : > { %366 = vmatprep.subr.bf16.mxu0 %v1355_v9  ;;  %1246 = vmatprep.subr.bf16.mxu1 %v1355_v9  ;;  %p1428_p8 = pneg %p1427_p6 }
  0x6d   : > { %p1434_p0 = por %p1433_p11, %p1432_p12 }
  0x6f   : > { %367 = vmatpush1.bf16.msra.mxu0 %v1357_v10  ;;  %1254 = vmatpush1.bf16.msra.mxu1 %v1357_v10  ;;  %p1435_p5 = pnand %p1434_p0, %p1428_p8 }
  0x70   : > { %368 = vmatprep.subr.bf16.mxu0 %v1358_v11  ;;  %1247 = vmatprep.subr.bf16.mxu1 %v1358_v11 }
  0x73   : > { %369 = vmatpush1.bf16.msra.mxu0 %v1360_v12  ;;  %1255 = vmatpush1.bf16.msra.mxu1 %v1360_v12 }
  0x74   : > { %370 = vmatprep.subr.bf16.mxu0 %v1361_v13  ;;  %1248 = vmatprep.subr.bf16.mxu1 %v1361_v13 }
  0x77   : > { %371 = vmatpush1.bf16.msra.mxu0 %v1363_v14  ;;  %1256 = vmatpush1.bf16.msra.mxu1 %v1363_v14 }
  0x78   : > { %372 = vmatprep.subr.bf16.mxu0 %v1364_v15  ;;  %1249 = vmatprep.subr.bf16.mxu1 %v1364_v15 }
  0x7b   : > { %373 = vmatpush1.bf16.msra.mxu0 %v1366_v16  ;;  %1257 = vmatpush1.bf16.msra.mxu1 %v1366_v16 }
  0x7e   : > { %391 = vmatmul.mubr.bf16.vlgmr.msra.gmra.mrb[0].mxu0 %v254_v21  ;;  %431 = vmatmul.mubr.bf16.vlgmr.msra.gmra.mrb[0].mxu1 %v258_v22 }
  0x7f   : > { %400 = vmatprep.mubr.bf16.mxu0 %v1549_v0  ;;  %440 = vmatprep.mubr.bf16.mxu1 %v1549_v0 }
  0x86   : > { %401 = vmatmul.mubr.bf16.gmra.mrb[4].mxu0 %v255_v27  ;;  %441 = vmatmul.mubr.bf16.gmra.mrb[4].mxu1 %v259_v28 }
  0x87   : > { %450 = vmatprep.mubr.bf16.mxu1 %v1549_v0  ;;  %410 = vmatprep.mubr.bf16.mxu0 %v1549_v0 }
  0x8e   : > { %451 = vmatmul.mubr.bf16.gmra.mrb[8].mxu1 %v260_v33  ;;  %411 = vmatmul.mubr.bf16.gmra.mrb[8].mxu0 %v256_v34 }
  0x8f   : > { %460 = vmatprep.mubr.bf16.mxu1 %v1549_v0  ;;  %420 = vmatprep.mubr.bf16.mxu0 %v1549_v0 }
  0x96   : > { %461 = vmatmul.mubr.bf16.gmra.mrb[12].mxu1 %v261_v39  ;;  %421 = vmatmul.mubr.bf16.gmra.mrb[12].mxu0 %v257_v40 }
 0x151   : > { %v1773_v41 = vpop.f32.mrb[0].mxu0  ;;  %v1775_v42 = vpop.f32.mrb[0].mxu1 }
 0x152   : > { %v394_v43 = vpop.f32.mrb[1].mxu0  ;;  %v434_v44 = vpop.f32.mrb[1].mxu1 }
 0x153   : > { %v1165_v45 = vpack.c.bf16 %v394_v43, %v394_v43  ;;  %v1777_v46 = vpop.f32.mrb[2].mxu0  ;;  %v1173_v47 = vpack.c.bf16 %v434_v44, %v434_v44  ;;  %v1779_v48 = vpop.f32.mrb[2].mxu1 }
 0x154   : > { %v398_v49 = vpop.f32.mrb[3].mxu0  ;;  %v438_v50 = vpop.f32.mrb[3].mxu1 }
 0x155   : > { %588 = vst.msk [vmem:[%s1781_s22] sm:$0xf] %vm587_vm0, %v1165_v45  ;;  %596 = vst.msk [vmem:[%s1781_s22 + $0x20] sm:$0xf] %vm587_vm0, %v1173_v47  ;;  %v1787_v51 = vpack.c.bf16 %v398_v49, %v398_v49  ;;  %v1789_v52 = vpack.c.bf16 %v438_v50, %v438_v50  ;;  %711 = vrot.lane.b32.xlu0 %v1165_v45, %s1550_s24  ;;  %625 = vrot.lane.b32.xlu1 %v1165_v45, %s1551_s10 }
 0x157   : > { %589 = vst.msk [vmem:[%s1781_s22 + $0x4] sm:$0xf] %vm587_vm0, %v1787_v51  ;;  %597 = vst.msk [vmem:[%s1781_s22 + $0x24] sm:$0xf] %vm587_vm0, %v1789_v52 }
 0x159   : > { %797 = vrot.lane.b32.xlu0 %v1165_v45, %s1552_s11  ;;  %641 = vrot.lane.b32.xlu1 %v1173_v47, %s1551_s10  ;;  %v1801_v53 = vpop.f32.mrb[4].mxu0  ;;  %v1803_v54 = vpop.f32.mrb[4].mxu1 }
 0x15a   : > { %v404_v55 = vpop.f32.mrb[5].mxu0  ;;  %v444_v56 = vpop.f32.mrb[5].mxu1 }
 0x15b   : > { %v1167_v57 = vpack.c.bf16 %v404_v55, %v404_v55  ;;  %v1175_v58 = vpack.c.bf16 %v444_v56, %v444_v56  ;;  %v1805_v59 = vpop.f32.mrb[6].mxu0  ;;  %v1807_v60 = vpop.f32.mrb[6].mxu1 }
 0x15c   : > { %v448_v61 = vpop.f32.mrb[7].mxu1  ;;  %v408_v62 = vpop.f32.mrb[7].mxu0 }
 0x15d   : > { %590 = vst.msk [vmem:[%s1781_s22 + $0x8] sm:$0xf] %vm587_vm0, %v1167_v57  ;;  %598 = vst.msk [vmem:[%s1781_s22 + $0x28] sm:$0xf] %vm587_vm0, %v1175_v58  ;;  %v1176_v63 = vpack.c.bf16 %v448_v61, %v448_v61  ;;  %813 = vrot.lane.b32.xlu0 %v1173_v47, %s1552_s11  ;;  %727 = vrot.lane.b32.xlu1 %v1173_v47, %s1550_s24  ;;  %v1168_v0 = vpack.c.bf16 %v408_v62, %v408_v62 }
 0x15f   : > { %599 = vst.msk [vmem:[%s1781_s22 + $0x2c] sm:$0xf] %vm587_vm0, %v1176_v63  ;;  %591 = vst.msk [vmem:[%s1781_s22 + $0xc] sm:$0xf] %vm587_vm0, %v1168_v0 }
 0x161   : > { %627 = vrot.lane.b32.xlu1 %v1787_v51, %s1551_s10  ;;  %801 = vrot.lane.b32.xlu0 %v1167_v57, %s1552_s11  ;;  %v1822_v1 = vpop.f32.mrb[8].mxu1  ;;  %v412_v2 = vpop.f32.mrb[8].mxu0 }
 0x162   : > { %v454_v3 = vpop.f32.mrb[9].mxu1  ;;  %v414_v4 = vpop.f32.mrb[9].mxu0 }
 0x163   : > { %v1177_v5 = vpack.c.bf16 %v454_v3, %v454_v3  ;;  %v1824_v6 = vpop.f32.mrb[10].mxu1  ;;  %v1169_v7 = vpack.c.bf16 %v414_v4, %v414_v4  ;;  %v416_v8 = vpop.f32.mrb[10].mxu0 }
 0x164   : > { %v458_v9 = vpop.f32.mrb[11].mxu1  ;;  %v418_v10 = vpop.f32.mrb[11].mxu0 }
 0x165   : > { %600 = vst.msk [vmem:[%s1781_s22 + $0x30] sm:$0xf] %vm587_vm0, %v1177_v5  ;;  %v1178_v11 = vpack.c.bf16 %v458_v9, %v458_v9  ;;  %643 = vrot.lane.b32.xlu1 %v1789_v52, %s1551_s10  ;;  %817 = vrot.lane.b32.xlu0 %v1175_v58, %s1552_s11  ;;  %592 = vst.msk [vmem:[%s1781_s22 + $0x10] sm:$0xf] %vm587_vm0, %v1169_v7  ;;  %v1170_v12 = vpack.c.bf16 %v418_v10, %v418_v10 }
 0x167   : > { %601 = vst.msk [vmem:[%s1781_s22 + $0x34] sm:$0xf] %vm587_vm0, %v1178_v11  ;;  %593 = vst.msk [vmem:[%s1781_s22 + $0x14] sm:$0xf] %vm587_vm0, %v1170_v12 }
 0x169   : > { %713 = vrot.lane.b32.xlu1 %v1787_v51, %s1550_s24  ;;  %735 = vrot.lane.b32.xlu0 %v1177_v5, %s1550_s24  ;;  %v1840_v13 = vpop.f32.mrb[12].mxu1  ;;  %v422_v14 = vpop.f32.mrb[12].mxu0 }
 0x16a   : > { %v464_v15 = vpop.f32.mrb[13].mxu1  ;;  %v424_v16 = vpop.f32.mrb[13].mxu0 }
 0x16b   : > { %v1842_v17 = vpack.c.bf16 %v464_v15, %v464_v15  ;;  %v1844_v18 = vpop.f32.mrb[14].mxu1  ;;  %v1171_v19 = vpack.c.bf16 %v424_v16, %v424_v16  ;;  %v426_v20 = vpop.f32.mrb[14].mxu0 }
 0x16c   : > { %v468_v21 = vpop.f32.mrb[15].mxu1  ;;  %v428_v22 = vpop.f32.mrb[15].mxu0 }
 0x16d   : > { %729 = vrot.lane.b32.xlu1 %v1789_v52, %s1550_s24  ;;  %805 = vrot.lane.b32.xlu0 %v1169_v7, %s1552_s11  ;;  %602 = vst.msk [vmem:[%s1781_s22 + $0x38] sm:$0xf] %vm587_vm0, %v1842_v17  ;;  %v1852_v23 = vpack.c.bf16 %v468_v21, %v468_v21  ;;  %594 = vst.msk [vmem:[%s1781_s22 + $0x18] sm:$0xf] %vm587_vm0, %v1171_v19  ;;  %v1856_v24 = vpack.c.bf16 %v428_v22, %v428_v22 }
 0x16f   : > { %603 = vst.msk [vmem:[%s1781_s22 + $0x3c] sm:$0xf] %vm587_vm0, %v1852_v23  ;;  %595 = vst.msk [vmem:[%s1781_s22 + $0x1c] sm:$0xf] %vm587_vm0, %v1856_v24 }
 0x171   : > { %799 = vrot.lane.b32.xlu1 %v1787_v51, %s1552_s11  ;;  %821 = vrot.lane.b32.xlu0 %v1177_v5, %s1552_s11 }
 0x175   : > { %815 = vrot.lane.b32.xlu1 %v1789_v52, %s1552_s11  ;;  %739 = vrot.lane.b32.xlu0 %v1842_v17, %s1550_s24 }
 0x179   : > { %629 = vrot.lane.b32.xlu1 %v1167_v57, %s1551_s10  ;;  %809 = vrot.lane.b32.xlu0 %v1171_v19, %s1552_s11 }
 0x17d   : > { %645 = vrot.lane.b32.xlu1 %v1175_v58, %s1551_s10 }
 0x181   : > { %715 = vrot.lane.b32.xlu1 %v1167_v57, %s1550_s24 }
 0x185   : > { %731 = vrot.lane.b32.xlu1 %v1175_v58, %s1550_s24 }
 0x189   : > { %631 = vrot.lane.b32.xlu1 %v1168_v0, %s1551_s10 }
 0x18d   : > { %647 = vrot.lane.b32.xlu1 %v1176_v63, %s1551_s10 }
 0x191   : > { %717 = vrot.lane.b32.xlu1 %v1168_v0, %s1550_s24 }
 0x195   : > { %733 = vrot.lane.b32.xlu1 %v1176_v63, %s1550_s24 }
 0x197   : > { %471 = vxpose.xlu0.b32.start [1/16] %v1773_v41, 128 }
 0x199   : > { %803 = vrot.lane.b32.xlu1 %v1168_v0, %s1552_s11 }
 0x19b   : > { %472 = vxpose.xlu0.b32.cont [2/16] %v1777_v46, 128 }
 0x19d   : > { %819 = vrot.lane.b32.xlu1 %v1176_v63, %s1552_s11 }
 0x19f   : > { %473 = vxpose.xlu0.b32.cont [3/16] %v1801_v53, 128 }
 0x1a1   : > { %633 = vrot.lane.b32.xlu1 %v1169_v7, %s1551_s10 }
 0x1a3   : > { %474 = vxpose.xlu0.b32.cont [4/16] %v1805_v59, 128 }
 0x1a5   : > { %649 = vrot.lane.b32.xlu1 %v1177_v5, %s1551_s10 }
 0x1a7   : > { %475 = vxpose.xlu0.b32.cont [5/16] %v412_v2, 128 }
 0x1a9   : > { %719 = vrot.lane.b32.xlu1 %v1169_v7, %s1550_s24 }
 0x1ab   : > { %476 = vxpose.xlu0.b32.cont [6/16] %v416_v8, 128 }
 0x1ad   : > { %635 = vrot.lane.b32.xlu1 %v1170_v12, %s1551_s10 }
 0x1af   : > { %477 = vxpose.xlu0.b32.cont [7/16] %v422_v14, 128 }
 0x1b1   : > { %651 = vrot.lane.b32.xlu1 %v1178_v11, %s1551_s10 }
 0x1b3   : > { %478 = vxpose.xlu0.b32.cont [8/16] %v426_v20, 128 }
 0x1b5   : > { %721 = vrot.lane.b32.xlu1 %v1170_v12, %s1550_s24 }
 0x1b7   : > { %479 = vxpose.xlu0.b32.cont [9/16] %v1775_v42, 128 }
 0x1b9   : > { %737 = vrot.lane.b32.xlu1 %v1178_v11, %s1550_s24 }
 0x1bb   : > { %480 = vxpose.xlu0.b32.cont [10/16] %v1779_v48, 128 }
 0x1bd   : > { %807 = vrot.lane.b32.xlu1 %v1170_v12, %s1552_s11 }
 0x1bf   : > { %481 = vxpose.xlu0.b32.cont [11/16] %v1803_v54, 128 }
 0x1c1   : > { %823 = vrot.lane.b32.xlu1 %v1178_v11, %s1552_s11 }
 0x1c3   : > { %482 = vxpose.xlu0.b32.cont [12/16] %v1807_v60, 128 }
 0x1c5   : > { %637 = vrot.lane.b32.xlu1 %v1171_v19, %s1551_s10 }
 0x1c7   : > { %v712_v25 = vpop.permute.xlu0 %711  ;;  %v626_v26 = vpop.permute.xlu1 %625  ;;  %483 = vxpose.xlu0.b32.cont [13/16] %v1822_v1, 128 }
 0x1c8   : > { %1112 = vst.msk [vmem:[%s1781_s22 + $0x80] sm:$0xf] %vm587_vm0, %v712_v25  ;;  %1088 = vst.msk [vmem:[%s1781_s22 + $0x40] sm:$0xf] %vm587_vm0, %v626_v26 }
 0x1c9   : > { %653 = vrot.lane.b32.xlu1 %v1842_v17, %s1551_s10 }
 0x1cb   : > { %v798_v27 = vpop.permute.xlu0 %797  ;;  %v642_v28 = vpop.permute.xlu1 %641  ;;  %484 = vxpose.xlu0.b32.cont [14/16] %v1824_v6, 128 }
 0x1cc   : > { %1136 = vst.msk [vmem:[%s1781_s22 + $0xc0] sm:$0xf] %vm587_vm0, %v798_v27  ;;  %1096 = vst.msk [vmem:[%s1781_s22 + $0x60] sm:$0xf] %vm587_vm0, %v642_v28 }
 0x1cd   : > { %723 = vrot.lane.b32.xlu1 %v1171_v19, %s1550_s24 }
 0x1cf   : > { %v814_v29 = vpop.permute.xlu0 %813  ;;  %v728_v30 = vpop.permute.xlu1 %727  ;;  %485 = vxpose.xlu0.b32.cont [15/16] %v1840_v13, 128 }
 0x1d0   : > { %1144 = vst.msk [vmem:[%s1781_s22 + $0xe0] sm:$0xf] %vm587_vm0, %v814_v29  ;;  %1120 = vst.msk [vmem:[%s1781_s22 + $0xa0] sm:$0xf] %vm587_vm0, %v728_v30 }
 0x1d1   : > { %639 = vrot.lane.b32.xlu1 %v1856_v24, %s1551_s10 }
 0x1d3   : > { %v628_v31 = vpop.permute.xlu1 %627  ;;  %v802_v32 = vpop.permute.xlu0 %801  ;;  %486 = vxpose.xlu0.b32.end [16/16] %v1844_v18, 128 }
 0x1d4   : > { %1089 = vst.msk [vmem:[%s1781_s22 + $0x44] sm:$0xf] %vm587_vm0, %v628_v31  ;;  %1138 = vst.msk [vmem:[%s1781_s22 + $0xc8] sm:$0xf] %vm587_vm0, %v802_v32 }
 0x1d5   : > { %655 = vrot.lane.b32.xlu1 %v1852_v23, %s1551_s10 }
 0x1d7   : > { %v644_v33 = vpop.permute.xlu1 %643  ;;  %v818_v34 = vpop.permute.xlu0 %817 }
 0x1d8   : > { %1097 = vst.msk [vmem:[%s1781_s22 + $0x64] sm:$0xf] %vm587_vm0, %v644_v33  ;;  %1146 = vst.msk [vmem:[%s1781_s22 + $0xe8] sm:$0xf] %vm587_vm0, %v818_v34 }
 0x1d9   : > { %725 = vrot.lane.b32.xlu1 %v1856_v24, %s1550_s24 }
 0x1db   : > { %v714_v35 = vpop.permute.xlu1 %713  ;;  %v736_v36 = vpop.permute.xlu0 %735 }
 0x1dc   : > { %1113 = vst.msk [vmem:[%s1781_s22 + $0x84] sm:$0xf] %vm587_vm0, %v714_v35  ;;  %1124 = vst.msk [vmem:[%s1781_s22 + $0xb0] sm:$0xf] %vm587_vm0, %v736_v36 }
 0x1dd   : > { %741 = vrot.lane.b32.xlu1 %v1852_v23, %s1550_s24 }
 0x1df   : > { %v730_v37 = vpop.permute.xlu1 %729  ;;  %v806_v38 = vpop.permute.xlu0 %805 }
 0x1e0   : > { %1121 = vst.msk [vmem:[%s1781_s22 + $0xa4] sm:$0xf] %vm587_vm0, %v730_v37  ;;  %1140 = vst.msk [vmem:[%s1781_s22 + $0xd0] sm:$0xf] %vm587_vm0, %v806_v38 }
 0x1e1   : > { %811 = vrot.lane.b32.xlu1 %v1856_v24, %s1552_s11 }
 0x1e3   : > { %v800_v39 = vpop.permute.xlu1 %799  ;;  %v822_v40 = vpop.permute.xlu0 %821 }
 0x1e4   : > { %1137 = vst.msk [vmem:[%s1781_s22 + $0xc4] sm:$0xf] %vm587_vm0, %v800_v39  ;;  %1148 = vst.msk [vmem:[%s1781_s22 + $0xf0] sm:$0xf] %vm587_vm0, %v822_v40 }
 0x1e5   : > { %827 = vrot.lane.b32.xlu1 %v1852_v23, %s1552_s11 }
 0x1e7   : > { %v816_v41 = vpop.permute.xlu1 %815  ;;  %v740_v42 = vpop.permute.xlu0 %739 }
 0x1e8   : > { %1145 = vst.msk [vmem:[%s1781_s22 + $0xe4] sm:$0xf] %vm587_vm0, %v816_v41  ;;  %1126 = vst.msk [vmem:[%s1781_s22 + $0xb8] sm:$0xf] %vm587_vm0, %v740_v42 }
 0x1eb   : > { %v630_v43 = vpop.permute.xlu1 %629  ;;  %v810_v44 = vpop.permute.xlu0 %809 }
 0x1ec   : > { %1090 = vst.msk [vmem:[%s1781_s22 + $0x48] sm:$0xf] %vm587_vm0, %v630_v43  ;;  %1142 = vst.msk [vmem:[%s1781_s22 + $0xd8] sm:$0xf] %vm587_vm0, %v810_v44 }
 0x1ef   : > { %v646_v45 = vpop.permute.xlu1 %645 }
 0x1f0   : > { %1098 = vst.msk [vmem:[%s1781_s22 + $0x68] sm:$0xf] %vm587_vm0, %v646_v45 }
 0x1f3   : > { %v716_v46 = vpop.permute.xlu1 %715 }
 0x1f4   : > { %1114 = vst.msk [vmem:[%s1781_s22 + $0x88] sm:$0xf] %vm587_vm0, %v716_v46 }
 0x1f7   : > { %v732_v47 = vpop.permute.xlu1 %731 }
 0x1f8   : > { %1122 = vst.msk [vmem:[%s1781_s22 + $0xa8] sm:$0xf] %vm587_vm0, %v732_v47 }
 0x1fb   : > { %v632_v48 = vpop.permute.xlu1 %631 }
 0x1fc   : > { %1091 = vst.msk [vmem:[%s1781_s22 + $0x4c] sm:$0xf] %vm587_vm0, %v632_v48  ;;  %825 = vrot.lane.b32.xlu0 %v1842_v17, %s1552_s11 }
 0x1ff   : > { %v648_v49 = vpop.permute.xlu1 %647 }
 0x200   : > { %1099 = vst.msk [vmem:[%s1781_s22 + $0x6c] sm:$0xf] %vm587_vm0, %v648_v49 }
 0x203   : > { %v718_v50 = vpop.permute.xlu1 %717 }
 0x204   : > { %1115 = vst.msk [vmem:[%s1781_s22 + $0x8c] sm:$0xf] %vm587_vm0, %v718_v50 }
 0x207   : > { %v734_v51 = vpop.permute.xlu1 %733 }
 0x208   : > { %1123 = vst.msk [vmem:[%s1781_s22 + $0xac] sm:$0xf] %vm587_vm0, %v734_v51 }
 0x20b   : > { %v804_v52 = vpop.permute.xlu1 %803 }
 0x20c   : > { %1139 = vst.msk [vmem:[%s1781_s22 + $0xcc] sm:$0xf] %vm587_vm0, %v804_v52 }
 0x20f   : > { %v820_v53 = vpop.permute.xlu1 %819 }
 0x210   : > { %1147 = vst.msk [vmem:[%s1781_s22 + $0xec] sm:$0xf] %vm587_vm0, %v820_v53 }
 0x213   : > { %v634_v54 = vpop.permute.xlu1 %633 }
 0x214   : > { %1092 = vst.msk [vmem:[%s1781_s22 + $0x50] sm:$0xf] %vm587_vm0, %v634_v54 }
 0x217   : > { %v650_v55 = vpop.permute.xlu1 %649  ;;  %v487_v56 = vpop.trf.xlu0 }
 0x218   : > { %1100 = vst.msk [vmem:[%s1781_s22 + $0x70] sm:$0xf] %vm587_vm0, %v650_v55 }
 0x21b   : > { %v720_v57 = vpop.permute.xlu1 %719  ;;  %v488_v58 = vpop.trf.xlu0 }
 0x21c   : > { %1116 = vst.msk [vmem:[%s1781_s22 + $0x90] sm:$0xf] %vm587_vm0, %v720_v57  ;;  %v1198_v59 = vpack.c.bf16 %v488_v58, %v487_v56 }
 0x21e   : > { %1199 = vst [vmem:[%s1986_s18] sm:$0xff] %v1198_v59  }
 0x21f   : > { %v636_v60 = vpop.permute.xlu1 %635  ;;  %v489_v61 = vpop.trf.xlu0 }
 0x220   : > { %1093 = vst.msk [vmem:[%s1781_s22 + $0x54] sm:$0xf] %vm587_vm0, %v636_v60 }
 0x223   : > { %v652_v62 = vpop.permute.xlu1 %651  ;;  %v490_v63 = vpop.trf.xlu0 }
 0x224   : > { %1101 = vst.msk [vmem:[%s1781_s22 + $0x74] sm:$0xf] %vm587_vm0, %v652_v62  ;;  %v1203_v0 = vpack.c.bf16 %v490_v63, %v489_v61 }
 0x226   : > { %1235 = vst [vmem:[%s1986_s18 + $0x8] sm:$0xff] %v1203_v0  }
 0x227   : > { %v722_v1 = vpop.permute.xlu1 %721  ;;  %v491_v2 = vpop.trf.xlu0 }
 0x228   : > { %1117 = vst.msk [vmem:[%s1781_s22 + $0x94] sm:$0xf] %vm587_vm0, %v722_v1 }
 0x22b   : > { %v738_v3 = vpop.permute.xlu1 %737  ;;  %v492_v4 = vpop.trf.xlu0 }
 0x22c   : > { %1125 = vst.msk [vmem:[%s1781_s22 + $0xb4] sm:$0xf] %vm587_vm0, %v738_v3  ;;  %v1208_v5 = vpack.c.bf16 %v492_v4, %v491_v2 }
 0x22e   : > { %1236 = vst [vmem:[%s1986_s18 + $0x10] sm:$0xff] %v1208_v5  }
 0x22f   : > { %v808_v6 = vpop.permute.xlu1 %807  ;;  %v493_v7 = vpop.trf.xlu0 }
 0x230   : > { %1141 = vst.msk [vmem:[%s1781_s22 + $0xd4] sm:$0xf] %vm587_vm0, %v808_v6 }
 0x233   : > { %v824_v8 = vpop.permute.xlu1 %823  ;;  %v494_v9 = vpop.trf.xlu0 }
 0x234   : > { %1149 = vst.msk [vmem:[%s1781_s22 + $0xf4] sm:$0xf] %vm587_vm0, %v824_v8  ;;  %v1213_v10 = vpack.c.bf16 %v494_v9, %v493_v7 }
 0x236   : > { %1237 = vst [vmem:[%s1986_s18 + $0x18] sm:$0xff] %v1213_v10  }
 0x237   : > { %v638_v11 = vpop.permute.xlu1 %637  ;;  %v495_v12 = vpop.trf.xlu0 }
 0x238   : > { %1094 = vst.msk [vmem:[%s1781_s22 + $0x58] sm:$0xf] %vm587_vm0, %v638_v11 }
 0x23b   : > { %v654_v13 = vpop.permute.xlu1 %653  ;;  %v496_v14 = vpop.trf.xlu0 }
 0x23c   : > { %1102 = vst.msk [vmem:[%s1781_s22 + $0x78] sm:$0xf] %vm587_vm0, %v654_v13  ;;  %v1218_v15 = vpack.c.bf16 %v496_v14, %v495_v12 }
 0x23e   : > { %1238 = vst [vmem:[%s1986_s18 + $0x20] sm:$0xff] %v1218_v15  }
 0x23f   : > { %v724_v16 = vpop.permute.xlu1 %723  ;;  %v497_v17 = vpop.trf.xlu0 }
 0x240   : > { %1118 = vst.msk [vmem:[%s1781_s22 + $0x98] sm:$0xf] %vm587_vm0, %v724_v16 }
 0x243   : > { %v640_v18 = vpop.permute.xlu1 %639  ;;  %v498_v19 = vpop.trf.xlu0 }
 0x244   : > { %1095 = vst.msk [vmem:[%s1781_s22 + $0x5c] sm:$0xf] %vm587_vm0, %v640_v18  ;;  %v1223_v20 = vpack.c.bf16 %v498_v19, %v497_v17 }
 0x246   : > { %1239 = vst [vmem:[%s1986_s18 + $0x28] sm:$0xff] %v1223_v20  }
 0x247   : > { %v656_v21 = vpop.permute.xlu1 %655  ;;  %v499_v22 = vpop.trf.xlu0 }
 0x248   : > { %1103 = vst.msk [vmem:[%s1781_s22 + $0x7c] sm:$0xf] %vm587_vm0, %v656_v21 }
 0x24b   : > { %v726_v23 = vpop.permute.xlu1 %725  ;;  %v500_v24 = vpop.trf.xlu0 }
 0x24c   : > { %1119 = vst.msk [vmem:[%s1781_s22 + $0x9c] sm:$0xf] %vm587_vm0, %v726_v23  ;;  %v1228_v25 = vpack.c.bf16 %v500_v24, %v499_v22 }
 0x24e   : > { %1240 = vst [vmem:[%s1986_s18 + $0x30] sm:$0xff] %v1228_v25  }
 0x24f   : > { %v742_v26 = vpop.permute.xlu1 %741  ;;  %v501_v27 = vpop.trf.xlu0 }
 0x250   : > { %1127 = vst.msk [vmem:[%s1781_s22 + $0xbc] sm:$0xf] %vm587_vm0, %v742_v26 }
 0x253   : > { %v812_v28 = vpop.permute.xlu1 %811  ;;  %v502_v29 = vpop.trf.xlu0 }
 0x254   : > { %1143 = vst.msk [vmem:[%s1781_s22 + $0xdc] sm:$0xf] %vm587_vm0, %v812_v28  ;;  %v1233_v30 = vpack.c.bf16 %v502_v29, %v501_v27 }
 0x256   : > { %1241 = vst [vmem:[%s1986_s18 + $0x38] sm:$0xff] %v1233_v30  }
 0x257   : > { %v828_v31 = vpop.permute.xlu1 %827 }
 0x258   : > { %1438 = shalt.err (!%p1435_p5)
}
 0x259   : > { %s1439_s10 = scalar_lea.hbm %s2030_s4, 1024  ;;  %s1443_s18 = scalar_lea.hbm %s2125_s2, 2048 }
 0x25a   : > { %p1440_p9 = scmp.ne.s32.totalorder %s2030_s4, %s1439_s10  ;;  %p1444_p3 = scmp.lt.u32.totalorder %s2030_s4, %s2125_s2 }
 0x25b   : > { %p1445_p7 = scmp.lt.u32.totalorder %s1443_s18, %s1439_s10  ;;  %p1447_p4 = scmp.lt.u32.totalorder %s1439_s10, %s2030_s4 }
 0x25c   : > { %p1441_p1 = pnand %p1440_p9, %p1675_p10 }
 0x25d   : > { %p1446_p13 = por %p1445_p7, %p1444_p3 }
 0x25e   : > { %p1442_p2 = pneg %p1441_p1 }
 0x25f   : > { %p1448_p6 = por %p1447_p4, %p1446_p13 }
 0x261   : > { %p1449_p8 = pnand %p1448_p6, %p1442_p2 }
 0x263   : > { %1452 = shalt.err (!%p1449_p8)
}
 0x264   : > { %s1554_s21 = smov 4   ;;  %1151 = vst.msk [vmem:[%s1781_s22 + $0xfc] sm:$0xf] %vm587_vm0, %v828_v31  ;;  %s1194_s29 = sshll.u32 %s1535_s15, 12 }
 0x265   : > { %1264 = dma.vmem_to_hbm [thread:$0]  (%p1675_p10), %s2023_s19, 1024, %s2030_s4, %s863_s6, %s1550_s24, %s1550_s24, %s1554_s21  }
 0x266   : > { %s900_s7 = sshll.u32 %s1781_s22, 4  ;;  %s2067_s10 = scalar_lea.hbm %s2126_s3, %s1194_s29  ;;  %s2069_s7 = int_to_ptr.vmem [resolvable:$true] %s900_s7 }
 0x267   : > { %s868_s11 = scalar_lea.sflag [#allocation9], %s1734_s30  ;;  %s1453_s9 = scalar_lea.vmem %s2069_s7, 4096 }
 0x268   : > { %p1454_p12 = scmp.ne.s32.totalorder %s2069_s7, %s1453_s9  ;;  %s1555_s15 = smov [#allocation8]  }
 0x269   : > { %s1457_s19 = sshll.u32 %s1555_s15, 4  ;;  %s1458_s19 = int_to_ptr.vmem [resolvable:$false] %s1457_s19 }
 0x26a   : > { %p1455_p11 = pnand %p1454_p12, %p1675_p10  ;;  %s1459_s4 = scalar_lea.vmem %s1458_s19, 8192 }
 0x26b   : > { %p1460_p5 = scmp.lt.s32.totalorder %s2069_s7, %s1458_s19  ;;  %p1461_p9 = scmp.lt.s32.totalorder %s1459_s4, %s1453_s9 }
 0x26c   : > { %p1456_p0 = pneg %p1455_p11 }
 0x26d   : > { %p1462_p1 = por %p1461_p9, %p1460_p5 }
 0x26e   : > { %v826_v32 = vpop.permute.xlu0 %825 }
 0x26f   : > { %1150 = vst.msk [vmem:[%s1781_s22 + $0xf8] sm:$0xf] %vm587_vm0, %v826_v32  ;;  %p1463_p2 = pnand %p1462_p1, %p1456_p0 }
 0x271   : > { %1466 = shalt.err (!%p1463_p2)
}
 0x272   : > { %s1467_s22 = scalar_lea.hbm %s2067_s10, 4096  ;;  %s1471_s25 = scalar_lea.hbm %s2126_s3, 8192 }
 0x273   : > { %p1468_p3 = scmp.ne.s32.totalorder %s2067_s10, %s1467_s22  ;;  %p1472_p4 = scmp.lt.u32.totalorder %s2067_s10, %s2126_s3 }
 0x274   : > { %p1473_p6 = scmp.lt.u32.totalorder %s1471_s25, %s1467_s22  ;;  %p1475_p12 = scmp.lt.u32.totalorder %s1467_s22, %s2067_s10 }
 0x275   : > { %p1469_p7 = pnand %p1468_p3, %p1675_p10 }
 0x276   : > { %p1474_p8 = por %p1473_p6, %p1472_p4 }
 0x277   : > { %p1470_p13 = pneg %p1469_p7 }
 0x278   : > { %p1476_p11 = por %p1475_p12, %p1474_p8 }
 0x27a   : > { %p1477_p0 = pnand %p1476_p11, %p1470_p13 }
 0x27c   : > { %1480 = shalt.err (!%p1477_p0)
}
 0x27d   : > { %1265 = dma.vmem_to_hbm [thread:$0]  (%p1675_p10), %s2069_s7, 4096, %s2067_s10, %s868_s11, %s1550_s24, %s1550_s24, %s1554_s21  }
 0x27e PF: > { %s915_s8 = sand.u32 1, %s1523_s12   ;;  %p2144_p5 = scmp.ne.s32.totalorder %s2134_s23, 0 }
 0x27f   : > { %p2145_p9 = scmp.ge.s32.totalorder %s1543_s17, 2  ;;  %s916_s20 = scalar_lea.sflag [#allocation4], %s915_s8 }
 0x281   : > { %p1277_p1 = pnand %p2145_p9, %p2144_p5 }
 0x283   : > { %1514 = dma.done.wait (!%p1277_p1), %s916_s20, 1024  }
 0x284   : > { %1516 = vsyncadd (!%p1277_p1), %s916_s20, 4294966272  ;;  %s925_s27 = scalar_lea.sflag [#allocation9], %s915_s8 }
 0x285   : > { %1518 = dma.done.wait (!%p1277_p1), %s925_s27, 4096  }
 0x286   : > { %1520 = vsyncadd (!%p1277_p1), %s925_s27, 4294963200  ;;  %s24_s17 = sadd.s32 1, %s1543_s17   ;;  %s2146_s12 = smov %s1527_s13 }
 0x287   : > { %p21_p2 = scmp.ge.s32.totalorder %s24_s17, 4   ;;  %s2147_s13 = smov %s1531_s14 }
 0x288   : > { %s2148_s14 = smov %s1684_s5  ;;  %s2149_s15 = smov %s1539_s16 }
 0x289   : > { %s2150_s16 = smov %s2152_s28  ;;  %23 = sbr.rel (!%p21_p2) target bundleno = 9 (0x9), region = 100 }
 0x290   :  { %930 = vsyncpa [#allocation3], 1 }
 0x291   :  { %932 = vsyncpa [#allocation3 + $0x1], 1 }
 0x292   :  { %933 = vsyncpa [#allocation6], 1 }
 0x293   :  { %934 = vsyncpa [#allocation4], 1 }
 0x294   :  { %936 = vsyncpa [#allocation4 + $0x1], 1 }
 0x295   :  { %937 = vsyncpa [#allocation9], 1 }
 0x296   :  { %939 = vsyncpa [#allocation9 + $0x1], 1 }

</bundles_post_ra>
